<compile_context>
chip_gen: v7x
topology: tpu7x:2x2x1
jax: 0.10.0
libtpu: 0.0.40
codegen_flags: <defaults>
</compile_context>

<pallas_src>
import functools

import jax
import jax.numpy as jnp
from jax.experimental import pallas as pl
from jax.experimental.pallas import tpu as pltpu


def _round_up(x, m):
    return (x + m - 1) // m * m


def _mlp_kernel(n_hidden, obs_dim, use_vpu_first, *refs):
    """One batch tile of the baseline MLP, batch on the lane axis.

    refs = (x_ref,                                   # (obs_dim, TM)
            w0, b0, ..., w_{n_hidden-1}, b_{n_hidden-1},  # (out_pad, in) / (out_pad, 1), f32
            w_last, b_last,                          # (feat_pad, 1), (1, 1), f32
            out_ref)                                 # (1, TM) lane-dense
    """
    x_ref = refs[0]
    out_ref = refs[-1]
    p = refs[1:-1]

    h = x_ref[...].astype(jnp.float32)                  # (features, TM), batch on lanes

    for layer in range(n_hidden):
        w = p[2 * layer][...]                           # (out_pad, in) f32 (transposed weight)
        b = p[2 * layer + 1][...]                       # (out_pad, 1) f32
        if layer == 0 and use_vpu_first:
            # K = obs_dim is tiny: obs_dim broadcast FMAs (outer products) on
            # the VPU, overlapping with downstream MXU work.
            acc = w[:, 0:1] * h[0:1, :]
            for k in range(1, obs_dim):
                acc = acc + w[:, k:k + 1] * h[k:k + 1, :]
        else:
            acc = jnp.dot(w, h, preferred_element_type=jnp.float32)   # MXU, f32
        h = jnp.maximum(acc + b, 0.0)                   # ReLU on hidden layers only

    w_last = p[2 * n_hidden][...]                       # (feat_pad, 1) f32
    b_last = p[2 * n_hidden + 1][...]                   # (1, 1) f32
    # Final 1-unit layer: VPU multiply + sublane reduce.  Batch stays on the
    # lane axis, so the result is already lane-dense: unmasked stores, no
    # cross-lane relayout.
    y = jnp.sum(h * w_last, axis=0, keepdims=True)      # (1, TM)
    out_ref[...] = (y + b_last).astype(out_ref.dtype)


def prepare_params(params, n_layers):
    """Transpose weights to (out, in), zero-pad hidden widths to multiples of
    128 (zero padding => exact math), keep everything f32 (PyTorch parity)."""
    flat = []
    for layer in range(n_layers):
        w, b = params[layer]                            # (in_dim, out_dim), (out_dim,)
        in_dim, out_dim = w.shape
        in_pad = in_dim if layer == 0 else _round_up(in_dim, 128)
        out_pad = _round_up(out_dim, 128)
        w_t = jnp.zeros((out_pad, in_pad), jnp.float32)
        w_t = w_t.at[:out_dim, :in_dim].set(w.T.astype(jnp.float32))
        b_p = jnp.zeros((out_pad, 1), jnp.float32)
        b_p = b_p.at[:out_dim, 0].set(b.astype(jnp.float32))
        flat += [w_t, b_p]

    w, b = params[n_layers]                             # (feat, 1), (1,)
    feat = w.shape[0]
    feat_pad = feat if n_layers == 0 else _round_up(feat, 128)
    w_last = jnp.zeros((feat_pad, 1), jnp.float32).at[:feat, :].set(
        w.astype(jnp.float32))
    b_last = b.reshape(1, 1).astype(jnp.float32)
    flat += [w_last, b_last]
    return flat


def _pick_tile_m(batch, obs_dim, size_pad, n_hidden):
    """Largest batch tile (multiple of 128) that fits comfortably in VMEM,
    while keeping at least 2 grid steps when batch > 128 (v7x megacore)."""
    del n_hidden  # only the live-slab count matters, handled via per_row
    obs_rows = _round_up(max(obs_dim, 1), 8)
    feat = max(size_pad, 8)
    # Bytes per batch row resident at once: double-buffered obs/out tiles plus
    # ~3 live activation slabs of the (padded) hidden width.
    per_row = 4 * (2 * obs_rows + 3 * feat + 2 * 8)
    budget = 16 * 1024 * 1024
    cap = (budget // per_row) // 128 * 128
    cap = max(128, min(4096, cap))
    if batch > 128:
        half = _round_up((batch + 1) // 2, 128)   # keep grid_n >= 2 for both TCs
        return max(128, min(cap, half))
    return 128


def _vmem_estimate(tm, obs_dim, size_pad, flat_params):
    """Padding-aware VMEM estimate (obs tile is sublane-padded, activations
    counted, params counted twice for default double-buffering)."""
    obs_rows = _round_up(max(obs_dim, 1), 8)
    feat = max(size_pad, 8)
    est = 0
    est += 2 * obs_rows * tm * 4          # double-buffered obs tile
    est += 2 * 8 * tm * 4                 # double-buffered out tile (1 -> 8 sublanes)
    est += 3 * feat * tm * 4              # live activation slabs
    pbytes = 0
    for p in flat_params:
        r, c = p.shape
        pbytes += _round_up(r, 8) * _round_up(c, 128) * 4
    est += 2 * pbytes                     # default pipelining double-buffers params
    # TODO(synk): single-buffer the constant-index weights (pl.Buffered(1) or
    # manual one-time DMA) to halve resident param VMEM for very wide nets.
    est += 2 << 20                        # compiler scratch headroom
    return est


def baseline_forward(observations, params, *, n_layers, tile_m=None):
    """Run the baseline MLP; returns a 1-D array of shape [batch]."""
    observations = observations.astype(jnp.float32)
    batch, obs_dim = observations.shape

    layer_size = params[0][0].shape[1] if n_layers >= 1 else 0
    size_pad = _round_up(layer_size, 128) if n_layers >= 1 else 0

    tm = tile_m if tile_m is not None else _pick_tile_m(batch, obs_dim,
                                                        size_pad, n_layers)
    grid_n = pl.cdiv(batch, tm)
    padded_batch = grid_n * tm

    # Lane-dense layout: batch on the 128-lane axis.  (A producer that can
    # emit observations already transposed should pass them that way and skip
    # this transpose.)
    obs_t = observations.T
    if padded_batch != batch:
        obs_t = jnp.pad(obs_t, ((0, 0), (0, padded_batch - batch)))

    flat_params = prepare_params(params, n_layers)
    use_vpu_first = n_layers >= 1 and obs_dim <= 16

    est = _vmem_estimate(tm, obs_dim, size_pad, flat_params)
    # Cap at 48 MiB: leaves headroom under v7x's 64 MiB physical VMEM and is
    # harmless on v5e/v6e (128 MiB).
    vmem_limit = int(min(max(2 * est, 32 << 20), 48 << 20))

    if n_layers >= 1:
        flops = 2 * batch * (obs_dim * layer_size
                             + max(n_layers - 1, 0) * layer_size * layer_size
                             + layer_size)
    else:
        flops = 2 * batch * obs_dim
    bytes_accessed = (batch * obs_dim + batch) * 4 + sum(
        int(p.size) * p.dtype.itemsize for p in flat_params)
    cost = pl.CostEstimate(flops=flops, transcendentals=0,
                           bytes_accessed=bytes_accessed)

    kernel = functools.partial(_mlp_kernel, n_layers, obs_dim, use_vpu_first)

    out2d = pl.pallas_call(
        kernel,
        out_shape=jax.ShapeDtypeStruct((1, padded_batch), jnp.float32),
        grid=(grid_n,),
        in_specs=[pl.BlockSpec((obs_dim, tm), lambda i: (0, i))]
        + [pl.BlockSpec(p.shape, lambda i: (0, 0)) for p in flat_params],
        out_specs=pl.BlockSpec((1, tm), lambda i: (0, i)),
        compiler_params=pltpu.CompilerParams(
            dimension_semantics=("parallel",),
            vmem_limit_bytes=vmem_limit,
        ),
        cost_estimate=cost,
    )(obs_t, *flat_params)

    # Lane i*tm..(i+1)*tm of the (1, padded_batch) output holds batch tile i;
    # drop the zero-padded tail columns.
    return out2d.reshape(padded_batch)[:batch]


def init_params(key, obs_dim, layer_size, n_layers, dtype=jnp.float32):
    """Deterministic parameter init (uniform, a la PyTorch Linear default)."""
    sizes = [obs_dim] + [layer_size] * n_layers + [1]
    params = []
    for i in range(len(sizes) - 1):
        fan_in, fan_out = sizes[i], sizes[i + 1]
        key, wkey, bkey = jax.random.split(key, 3)
        bound = 1.0 / float(fan_in) ** 0.5
        w = jax.random.uniform(wkey, (fan_in, fan_out), dtype,
                               minval=-bound, maxval=bound)
        b = jax.random.uniform(bkey, (fan_out,), dtype,
                               minval=-bound, maxval=bound)
        params.append((w, b))
    return params


# TODO(synk): Adam optimizer / MSE update (update_baseline) and the
# numpy-based calculate_advantage are host-side training logic, not part of
# the forward pass, and are not implemented as Pallas kernels.

if __name__ == "__main__":
    # Small config consistent with the module: obs_dim from env (e.g. CartPole),
    # n_layers / layer_size from config.  batch chosen to exercise two batch
    # tiles (grid_n = 2) plus a zero-padded tail.
    batch = 200
    obs_dim = 4
    layer_size = 64
    n_layers = 2

    key = jax.random.PRNGKey(0)
    key, obs_key = jax.random.split(key)
    observations = jax.random.normal(obs_key, (batch, obs_dim), jnp.float32)
    params = init_params(key, obs_dim, layer_size, n_layers)

    out = baseline_forward(observations, params, n_layers=n_layers)
    out = jax.block_until_ready(out)
    assert out.ndim == 1 and out.shape == (batch,), out.shape

    # Pure-f32 reference — same math as the PyTorch BaselineNetwork.forward.
    h = observations
    for i in range(n_layers):
        w, b = params[i]
        h = jnp.maximum(h @ w + b, 0.0)
    w, b = params[n_layers]
    ref = (h @ w).reshape(batch) + b[0]
    err = float(jnp.max(jnp.abs(out - ref)))
    assert jnp.allclose(out, ref, atol=2e-3, rtol=2e-3), err

    print("KERNEL_OK")
</pallas_src>

<mosaic_0001>
module attributes {stable_mosaic.version = 11 : i64} {
  func.func @_mlp_kernel(%arg0: i32, %arg1: memref<4x128xf32, #tpu.memory_space<vmem>>, %arg2: memref<128x4xf32, #tpu.memory_space<vmem>>, %arg3: memref<128x1xf32, #tpu.memory_space<vmem>>, %arg4: memref<128x128xf32, #tpu.memory_space<vmem>>, %arg5: memref<128x1xf32, #tpu.memory_space<vmem>>, %arg6: memref<128x1xf32, #tpu.memory_space<vmem>>, %arg7: memref<1x1xf32, #tpu.memory_space<vmem>>, %arg8: memref<1x128xf32, #tpu.memory_space<vmem>>) attributes {dimension_semantics = [#tpu.dimension_semantics<parallel>], iteration_bounds = array<i64: 2>, scalar_prefetch = 0 : i64, scratch_operands = 0 : i64, tpu.core_type = #tpu.core_type<tc>, window_params = [{transform_indices = @transform_0, window_bounds = array<i64: 4, 128>}, {pipeline_mode = #tpu.pipeline_mode<synchronous>, transform_indices = @transform_1, window_bounds = array<i64: 128, 4>}, {pipeline_mode = #tpu.pipeline_mode<synchronous>, transform_indices = @transform_2, window_bounds = array<i64: 128, 1>}, {pipeline_mode = #tpu.pipeline_mode<synchronous>, transform_indices = @transform_3, window_bounds = array<i64: 128, 128>}, {pipeline_mode = #tpu.pipeline_mode<synchronous>, transform_indices = @transform_4, window_bounds = array<i64: 128, 1>}, {pipeline_mode = #tpu.pipeline_mode<synchronous>, transform_indices = @transform_5, window_bounds = array<i64: 128, 1>}, {pipeline_mode = #tpu.pipeline_mode<synchronous>, transform_indices = @transform_6, window_bounds = array<i64: 1, 1>}, {transform_indices = @transform_7, window_bounds = array<i64: 1, 128>}]} {
    %c0 = arith.constant 0 : index
    %c0_0 = arith.constant 0 : index
    %0 = vector.load %arg1[%c0, %c0_0] : memref<4x128xf32, #tpu.memory_space<vmem>>, vector<4x128xf32>
    %c0_1 = arith.constant 0 : index
    %c0_2 = arith.constant 0 : index
    %1 = vector.load %arg2[%c0_1, %c0_2] : memref<128x4xf32, #tpu.memory_space<vmem>>, vector<128x4xf32>
    %c0_3 = arith.constant 0 : index
    %c0_4 = arith.constant 0 : index
    %2 = vector.load %arg3[%c0_3, %c0_4] : memref<128x1xf32, #tpu.memory_space<vmem>>, vector<128x1xf32>
    %3 = vector.extract_strided_slice %1 {offsets = [0, 0], sizes = [128, 1], strides = [1, 1]} : vector<128x4xf32> to vector<128x1xf32>
    %4 = vector.extract_strided_slice %0 {offsets = [0, 0], sizes = [1, 128], strides = [1, 1]} : vector<4x128xf32> to vector<1x128xf32>
    %5 = vector.broadcast %3 : vector<128x1xf32> to vector<128x128xf32>
    %6 = vector.broadcast %4 : vector<1x128xf32> to vector<128x128xf32>
    %7 = arith.mulf %5, %6 : vector<128x128xf32>
    %8 = vector.extract_strided_slice %1 {offsets = [0, 1], sizes = [128, 1], strides = [1, 1]} : vector<128x4xf32> to vector<128x1xf32>
    %9 = vector.extract_strided_slice %0 {offsets = [1, 0], sizes = [1, 128], strides = [1, 1]} : vector<4x128xf32> to vector<1x128xf32>
    %10 = vector.broadcast %8 : vector<128x1xf32> to vector<128x128xf32>
    %11 = vector.broadcast %9 : vector<1x128xf32> to vector<128x128xf32>
    %12 = arith.mulf %10, %11 : vector<128x128xf32>
    %13 = arith.addf %7, %12 : vector<128x128xf32>
    %14 = vector.extract_strided_slice %1 {offsets = [0, 2], sizes = [128, 1], strides = [1, 1]} : vector<128x4xf32> to vector<128x1xf32>
    %15 = vector.extract_strided_slice %0 {offsets = [2, 0], sizes = [1, 128], strides = [1, 1]} : vector<4x128xf32> to vector<1x128xf32>
    %16 = vector.broadcast %14 : vector<128x1xf32> to vector<128x128xf32>
    %17 = vector.broadcast %15 : vector<1x128xf32> to vector<128x128xf32>
    %18 = arith.mulf %16, %17 : vector<128x128xf32>
    %19 = arith.addf %13, %18 : vector<128x128xf32>
    %20 = vector.extract_strided_slice %1 {offsets = [0, 3], sizes = [128, 1], strides = [1, 1]} : vector<128x4xf32> to vector<128x1xf32>
    %21 = vector.extract_strided_slice %0 {offsets = [3, 0], sizes = [1, 128], strides = [1, 1]} : vector<4x128xf32> to vector<1x128xf32>
    %22 = vector.broadcast %20 : vector<128x1xf32> to vector<128x128xf32>
    %23 = vector.broadcast %21 : vector<1x128xf32> to vector<128x128xf32>
    %24 = arith.mulf %22, %23 : vector<128x128xf32>
    %25 = arith.addf %19, %24 : vector<128x128xf32>
    %26 = vector.broadcast %2 : vector<128x1xf32> to vector<128x128xf32>
    %27 = arith.addf %25, %26 : vector<128x128xf32>
    %cst = arith.constant 0.000000e+00 : f32
    %28 = vector.broadcast %cst : f32 to vector<128x128xf32>
    %29 = arith.maximumf %27, %28 : vector<128x128xf32>
    %c0_5 = arith.constant 0 : index
    %c0_6 = arith.constant 0 : index
    %30 = vector.load %arg4[%c0_5, %c0_6] : memref<128x128xf32, #tpu.memory_space<vmem>>, vector<128x128xf32>
    %c0_7 = arith.constant 0 : index
    %c0_8 = arith.constant 0 : index
    %31 = vector.load %arg5[%c0_7, %c0_8] : memref<128x1xf32, #tpu.memory_space<vmem>>, vector<128x1xf32>
    %cst_9 = arith.constant dense<0.000000e+00> : vector<128x128xf32>
    %32 = tpu.matmul %30, %29, %cst_9 {dimension_numbers = #tpu.dot_dimension_numbers<[1], [0], [0], [1], [0, 0, 1, 1], [], []>} : vector<128x128xf32>, vector<128x128xf32>, vector<128x128xf32> -> vector<128x128xf32>
    %33 = vector.broadcast %31 : vector<128x1xf32> to vector<128x128xf32>
    %34 = arith.addf %32, %33 : vector<128x128xf32>
    %cst_10 = arith.constant 0.000000e+00 : f32
    %35 = vector.broadcast %cst_10 : f32 to vector<128x128xf32>
    %36 = arith.maximumf %34, %35 : vector<128x128xf32>
    %c0_11 = arith.constant 0 : index
    %c0_12 = arith.constant 0 : index
    %37 = vector.load %arg6[%c0_11, %c0_12] : memref<128x1xf32, #tpu.memory_space<vmem>>, vector<128x1xf32>
    %c0_13 = arith.constant 0 : index
    %c0_14 = arith.constant 0 : index
    %38 = vector.load %arg7[%c0_13, %c0_14] : memref<1x1xf32, #tpu.memory_space<vmem>>, vector<1x1xf32>
    %39 = vector.broadcast %37 : vector<128x1xf32> to vector<128x128xf32>
    %40 = arith.mulf %36, %39 : vector<128x128xf32>
    %cst_15 = arith.constant dense<0.000000e+00> : vector<128xf32>
    %41 = vector.multi_reduction <add>, %40, %cst_15 [0] : vector<128x128xf32> to vector<128xf32>
    %42 = vector.shape_cast %41 : vector<128xf32> to vector<1x128xf32>
    %43 = vector.broadcast %38 : vector<1x1xf32> to vector<1x128xf32>
    %44 = arith.addf %42, %43 : vector<1x128xf32>
    %c0_16 = arith.constant 0 : index
    %c0_17 = arith.constant 0 : index
    %45 = vector.load %arg8[%c0_16, %c0_17] : memref<1x128xf32, #tpu.memory_space<vmem>>, vector<1x128xf32>
    tpu.vector_store %arg8[%c0_16, %c0_17], %44 {strides = array<i32>} : memref<1x128xf32, #tpu.memory_space<vmem>>, vector<1x128xf32>,
    return
  }
  func.func @transform_0(%arg0: i32) -> (i32, i32) {
    %c0_i32 = arith.constant 0 : i32
    %c0_i32_0 = arith.constant 0 : i32
    return %c0_i32, %arg0 : i32, i32
  }
  func.func @transform_1(%arg0: i32) -> (i32, i32) {
    %c0_i32 = arith.constant 0 : i32
    %c0_i32_0 = arith.constant 0 : i32
    %c0_i32_1 = arith.constant 0 : i32
    return %c0_i32, %c0_i32_0 : i32, i32
  }
  func.func @transform_2(%arg0: i32) -> (i32, i32) {
    %c0_i32 = arith.constant 0 : i32
    %c0_i32_0 = arith.constant 0 : i32
    %c0_i32_1 = arith.constant 0 : i32
    return %c0_i32, %c0_i32_0 : i32, i32
  }
  func.func @transform_3(%arg0: i32) -> (i32, i32) {
    %c0_i32 = arith.constant 0 : i32
    %c0_i32_0 = arith.constant 0 : i32
    %c0_i32_1 = arith.constant 0 : i32
    return %c0_i32, %c0_i32_0 : i32, i32
  }
  func.func @transform_4(%arg0: i32) -> (i32, i32) {
    %c0_i32 = arith.constant 0 : i32
    %c0_i32_0 = arith.constant 0 : i32
    %c0_i32_1 = arith.constant 0 : i32
    return %c0_i32, %c0_i32_0 : i32, i32
  }
  func.func @transform_5(%arg0: i32) -> (i32, i32) {
    %c0_i32 = arith.constant 0 : i32
    %c0_i32_0 = arith.constant 0 : i32
    %c0_i32_1 = arith.constant 0 : i32
    return %c0_i32, %c0_i32_0 : i32, i32
  }
  func.func @transform_6(%arg0: i32) -> (i32, i32) {
    %c0_i32 = arith.constant 0 : i32
    %c0_i32_0 = arith.constant 0 : i32
    %c0_i32_1 = arith.constant 0 : i32
    return %c0_i32, %c0_i32_0 : i32, i32
  }
  func.func @transform_7(%arg0: i32) -> (i32, i32) {
    %c0_i32 = arith.constant 0 : i32
    %c0_i32_0 = arith.constant 0 : i32
    return %c0_i32, %arg0 : i32, i32
  }
}

</mosaic_0001>

<bundles_post_ra>
// kernel: tpu_custom_call.1
= control target key start
LH: loop header
LB: loop body
LE: loop exit
PB: predicated region body
PF: predicated region fallthrough
CT: control target
= control target key end

     0   :  { %s2291_s0 = inlined_call_operand.vmem [shape: f32[4,256], index: 0, kind: input, shape index: {}]   ;;  %s2292_s1 = inlined_call_operand.vmem [shape: f32[128,4], index: 1, kind: input, shape index: {}]   ;;  %s2293_s2 = inlined_call_operand.vmem [shape: f32[128,1], index: 2, kind: input, shape index: {}]   ;;  %s2294_s3 = inlined_call_operand.vmem [shape: f32[128,128], index: 3, kind: input, shape index: {}]   ;;  %s2295_s4 = inlined_call_operand.vmem [shape: f32[128,1], index: 4, kind: input, shape index: {}]   ;;  %s2296_s5 = inlined_call_operand.vmem [shape: f32[128,1], index: 5, kind: input, shape index: {}]   ;;  %s2297_s6 = inlined_call_operand.<no memory space> [shape: f32[1,1], index: 6, kind: input, shape index: {}]   ;;  %s2298_s7 = inlined_call_operand.hbm [shape: f32[1,256], index: 7, kind: output, shape index: {}]  }
   0x1   :  { %v12_v0 = vstv %s2297_s6 }
   0x2   :  { %13 = vst [vmem:[#allocation2] sm:$0x1] %v12_v0 }
   0x3   :  { %14 = vsyncpa [#allocation4], 0 }
   0x4   :  { %16 = vsyncpa [#allocation4 + $0x1], 0  ;;  %s1641_s26 = smov 0   ;;  %s1643_s27 = smov 0  }
   0x5   :  { %s1645_s28 = smov 0   ;;  %s1647_s29 = smov 0  }
   0x6 LB: > { %s1662_s6 = sadd.s32 4294967295, %s1591_s29   ;;  %s1306_s30 = sadd.s32 4294967294, %s1591_s29   ;;  %s1591_s29 = sphi %s1647_s29, %s2304_s29   ;;  %s1587_s28 = sphi %s1645_s28, %s2303_s28   ;;  %s1583_s27 = sphi %s1643_s27, %s2302_s27   ;;  %s1579_s26 = sphi %s1641_s26, %s2301_s26  }
   0x7   : > { %s1666_s8 = sadd.s32 1, %s1591_s29   ;;  %s181_s9 = sadd.s32 1, %s1587_s28 }
   0x8   : > { %s178_s10 = ssub.s32 %s1591_s29, %s1666_s8  ;;  %p191_p0 = scmp.ne.s32.totalorder %s1587_s28, %s1583_s27 }
   0x9   : > { %p179_p1 = scmp.eq.s32.totalorder %s178_s10, 0  ;;  %p192_p2 = scmp.eq.s32.totalorder %s1662_s6, 1 }
   0xa   : > { %p197_p3 = scmp.ne.s32.totalorder %s1583_s27, %s1579_s26  ;;  %p198_p4 = scmp.eq.s32.totalorder %s1306_s30, 1 }
   0xb   : > { %s1677_s11 = scalar_select %p179_p1, %s1587_s28, %s181_s9  }
   0xc   : > { %p1679_p5 = por %p192_p2, %p191_p0  ;;  %p1683_p6 = por %p198_p4, %p197_p3 }
   0xd   : > { %p1309_p7 = scmp.ge.s32.totalorder %s1591_s29, 1  ;;  %p241_p8 = scmp.lt.s32.totalorder %s1591_s29, 3 }
   0xf   : > { %p242_p9 = pnand %p1309_p7, %p241_p8 }
  0x10   : > { %v1692_v1 = vld [vmem:[%s2292_s1 + $0x10] sm:$0xff] (!%p242_p9)  ;;  %v276_v2 = vld [vmem:[%s2292_s1] sm:$0xff] (!%p242_p9)  ;;  %v1593_v3 = vmov (!%p242_p9), 0   ;;  %v1703_v4 = vld [vmem:[%s2292_s1 + $0x18] sm:$0xff] (!%p242_p9)  ;;  %v1594_v19 = vmov (!%p242_p9), 1   ;;  %v1595_v21 = vmov (!%p242_p9), 2   ;;  %v388_v32 = vlaneseq (!%p242_p9) }
  0x11   : > { %245 = sbr.rel (%p242_p9) target bundleno = 661 (0x295), region = 48  ;;  %1494 = vset.pattern.permute.xlu1 (!%p242_p9), %v1593_v3  ;;  %1493 = vset.pattern.permute.xlu0 (!%p242_p9), %v1593_v3  ;;  %v277_v5 = vld [vmem:[%s2292_s1 + $0x8] sm:$0xff] (!%p242_p9)  ;;  %v1717_v7 = vld [vmem:[%s2292_s1 + $0x20] sm:$0xff] (!%p242_p9)  ;;  %v1724_v8 = vld [vmem:[%s2292_s1 + $0x38] sm:$0xff] (!%p242_p9)  ;;  %v1596_v22 = vmov (!%p242_p9), 3   ;;  %p271_p10 = scmp.lt.s32.totalorder (!%p242_p9), %s1662_s6, 1 }
  0x12   : > { %320 = vperm.xlu1 (!%p242_p9), %1494, %v1692_v1   ;;  %310 = vperm.xlu0 (!%p242_p9), %1493, %v276_v2   ;;  %v1712_v6 = vld [vmem:[%s2292_s1 + $0x28] sm:$0xff] (!%p242_p9)  ;;  %v1729_v9 = vld [vmem:[%s2292_s1 + $0x30] sm:$0xff] (!%p242_p9)  ;;  %v1741_v11 = vld [vmem:[%s2292_s1 + $0x40] sm:$0xff] (!%p242_p9)  ;;  %v1871_v36 = vshrl.u32 (!%p242_p9), %v388_v32, 7  ;;  %s1311_s15 = sshll.u32 (!%p242_p9), %s1662_s6, 4  ;;  %s1597_s22 = smov (!%p242_p9), [#allocation3]  }
  0x13   : > { %v1736_v10 = vld [vmem:[%s2292_s1 + $0x48] sm:$0xff] (!%p242_p9)  ;;  %v1748_v12 = vld [vmem:[%s2292_s1 + $0x58] sm:$0xff] (!%p242_p9)  ;;  %v1753_v13 = vld [vmem:[%s2292_s1 + $0x50] sm:$0xff] (!%p242_p9)  ;;  %s2249_s20 = scalar_lea.hbm (!%p242_p9), %s2298_s7, %s1311_s15  ;;  %s1533_s23 = sshll.u32 (!%p242_p9), %s1597_s22, 4  ;;  %s1534_s23 = int_to_ptr.vmem [resolvable:$false] %s1533_s23 }
  0x14   : > { %v1760_v14 = vld [vmem:[%s2292_s1 + $0x68] sm:$0xff] (!%p242_p9)  ;;  %v1765_v15 = vld [vmem:[%s2292_s1 + $0x60] sm:$0xff] (!%p242_p9)  ;;  %v1772_v16 = vld [vmem:[%s2292_s1 + $0x78] sm:$0xff] (!%p242_p9)  ;;  %v390_v40 = vsub.s32 (!%p242_p9), 0, %v1871_v36 }
  0x15   : > { %v1777_v17 = vld [vmem:[%s2292_s1 + $0x70] sm:$0xff] (!%p242_p9)  ;;  %v297_v20 = vld [vmem:[%s2293_s2 + $0x28] sm:$0xff] (!%p242_p9)  ;;  %v292_v23 = vld [vmem:[%s2293_s2] sm:$0xff] (!%p242_p9) }
  0x16   : > { %325 = vperm.xlu1 (!%p242_p9), %1494, %v1703_v4   ;;  %315 = vperm.xlu0 (!%p242_p9), %1493, %v277_v5   ;;  %v294_v18 = vld [vmem:[%s2293_s2 + $0x10] sm:$0xff] (!%p242_p9)  ;;  %v293_v24 = vld [vmem:[%s2293_s2 + $0x8] sm:$0xff] (!%p242_p9)  ;;  %v295_v25 = vld [vmem:[%s2293_s2 + $0x18] sm:$0xff] (!%p242_p9) }
  0x17   : > { %v300_v26 = vld [vmem:[%s2293_s2 + $0x40] sm:$0xff] (!%p242_p9)  ;;  %v303_v27 = vld [vmem:[%s2293_s2 + $0x58] sm:$0xff] (!%p242_p9)  ;;  %v305_v28 = vld [vmem:[%s2293_s2 + $0x68] sm:$0xff] (!%p242_p9) }
  0x18   : > { %v296_v29 = vld [vmem:[%s2293_s2 + $0x20] sm:$0xff]  ;;  %s272_s21 = scalar_select %p271_p10, %s1662_s6, 1  ;;  %v838_v31 = vld [vmem:[%s2295_s4 + $0x10] sm:$0xff]  ;;  %v1094_v39 = vld [vmem:[%s2296_s5 + $0x8] sm:$0xff] }
  0x19   : > { %v836_v30 = vld [vmem:[%s2295_s4] sm:$0xff]  ;;  %v841_v44 = vld [vmem:[%s2295_s4 + $0x28] sm:$0xff]  ;;  %v842_v49 = vld [vmem:[%s2295_s4 + $0x30] sm:$0xff] }
  0x1a   : > { %335 = vperm.xlu1 %1494, %v1712_v6   ;;  %330 = vperm.xlu0 %1493, %v1717_v7   ;;  %s1310_s24 = sshll.u32 %s272_s21, 2  ;;  %v840_v35 = vld [vmem:[%s2295_s4 + $0x20] sm:$0xff]  ;;  %v298_v53 = vld [vmem:[%s2293_s2 + $0x30] sm:$0xff]  ;;  %v843_v54 = vld [vmem:[%s2295_s4 + $0x38] sm:$0xff] }
  0x1b   : > { %s274_s14 = scalar_lea.vmem %s2291_s0, %s1310_s24  ;;  %v299_v58 = vld [vmem:[%s2293_s2 + $0x38] sm:$0xff]  ;;  %v844_v59 = vld [vmem:[%s2295_s4 + $0x40] sm:$0xff]  ;;  %v845_v63 = vld [vmem:[%s2295_s4 + $0x48] sm:$0xff]  ;;  %s1535_s24 = scalar_lea.vmem %s1534_s23, 32 }
  0x1c   : > { %v1885_v41 = vld [vmem:[%s274_s14] sm:$0xf]  ;;  %s269_s14 = sand.u32 1, %s1583_s27  }
  0x1d   : > { %v1899_v45 = vrot.slane %v1885_v41, %v390_v40  ;;  %s270_s16 = scalar_lea.vmem [#allocation3], %s269_s14  ;;  %s1239_s21 = scalar_lea.sflag [#allocation4], %s269_s14 }
  0x1e   : > { %345 = vperm.xlu1 %1494, %v1724_v8   ;;  %340 = vperm.xlu0 %1493, %v1729_v9   ;;  %s1251_s17 = sshll.u32 %s270_s16, 4  ;;  %s2251_s17 = int_to_ptr.vmem [resolvable:$true] %s1251_s17 }
  0x1f   : > { %s1529_s6 = scalar_lea.vmem %s2251_s17, 16  ;;  %p1536_p0 = scmp.lt.s32.totalorder %s2251_s17, %s1534_s23 }
  0x20   : > { %p1530_p11 = scmp.ne.s32.totalorder %s2251_s17, %s1529_s6  ;;  %p1537_p1 = scmp.lt.s32.totalorder %s1535_s24, %s1529_s6 }
  0x22   : > { %355 = vperm.xlu1 %1494, %v1736_v10   ;;  %350 = vperm.xlu0 %1493, %v1741_v11   ;;  %p1531_p12 = pnand %p1530_p11, %p1679_p5  ;;  %p1538_p2 = por %p1537_p1, %p1536_p0 }
  0x24   : > { %p1532_p13 = pneg %p1531_p12 }
  0x26   : > { %365 = vperm.xlu1 %1494, %v1748_v12   ;;  %360 = vperm.xlu0 %1493, %v1753_v13   ;;  %p1539_p3 = pnand %p1538_p2, %p1532_p13 }
  0x2a   : > { %375 = vperm.xlu1 %1494, %v1760_v14   ;;  %370 = vperm.xlu0 %1493, %v1765_v15  }
  0x2e   : > { %385 = vperm.xlu1 %1494, %v1772_v16   ;;  %380 = vperm.xlu0 %1493, %v1777_v17  }
  0x32   : > { %1495 = vset.pattern.permute.xlu1 %v1594_v19  ;;  %720 = vperm.xlu0 %1493, %v294_v18  }
  0x33   : > { %413 = vperm.xlu1 %1495, %v277_v5  }
  0x36   : > { %735 = vperm.xlu0 %1493, %v297_v20   ;;  %v849_v20 = vld [vmem:[%s2295_s4 + $0x68] sm:$0xff] }
  0x37   : > { %417 = vperm.xlu1 %1495, %v1692_v1  }
  0x3a   : > { %1510 = vset.pattern.permute.xlu0 %v1594_v19 }
  0x3b   : > { %1496 = vset.pattern.permute.xlu1 %v1595_v21  ;;  %409 = vperm.xlu0 %1510, %v276_v2  }
  0x3c   : > { %509 = vperm.xlu1 %1496, %v276_v2  }
  0x3f   : > { %421 = vperm.xlu0 %1510, %v1703_v4  }
  0x40   : > { %1497 = vset.pattern.permute.xlu1 %v1596_v22 }
  0x41   : > { %609 = vperm.xlu1 %1497, %v276_v2  }
  0x43   : > { %425 = vperm.xlu0 %1510, %v1717_v7  }
  0x45   : > { %613 = vperm.xlu1 %1497, %v277_v5  }
  0x47   : > { %437 = vperm.xlu0 %1510, %v1724_v8  }
  0x49   : > { %1498 = vset.pattern.permute.xlu1 %v1595_v21 }
  0x4a   : > { %521 = vperm.xlu1 %1498, %v1703_v4  }
  0x4b   : > { %449 = vperm.xlu0 %1510, %v1753_v13  }
  0x4e   : > { %1499 = vset.pattern.permute.xlu1 %v1594_v19 }
  0x4f   : > { %429 = vperm.xlu1 %1499, %v1712_v6   ;;  %461 = vperm.xlu0 %1510, %v1760_v14  }
  0x53   : > { %1500 = vset.pattern.permute.xlu1 %v1596_v22  ;;  %1517 = vset.pattern.permute.xlu0 %v1595_v21 }
  0x54   : > { %617 = vperm.xlu1 %1500, %v1692_v1   ;;  %513 = vperm.xlu0 %1517, %v277_v5  }
  0x58   : > { %1501 = vset.pattern.permute.xlu1 %v1593_v3  ;;  %517 = vperm.xlu0 %1517, %v1692_v1  }
  0x59   : > { %710 = vperm.xlu1 %1501, %v292_v23  }
  0x5c   : > { %525 = vperm.xlu0 %1517, %v1717_v7  }
  0x5d   : > { %715 = vperm.xlu1 %1501, %v293_v24   ;;  %v301_v24 = vld [vmem:[%s2293_s2 + $0x48] sm:$0xff] }
  0x60   : > { %537 = vperm.xlu0 %1517, %v1724_v8  }
  0x61   : > { %1502 = vset.pattern.permute.xlu1 %v1595_v21 }
  0x62   : > { %529 = vperm.xlu1 %1502, %v1712_v6  }
  0x64   : > { %549 = vperm.xlu0 %1517, %v1753_v13  }
  0x66   : > { %1503 = vset.pattern.permute.xlu1 %v1594_v19 }
  0x67   : > { %433 = vperm.xlu1 %1503, %v1729_v9  }
  0x68   : > { %561 = vperm.xlu0 %1517, %v1760_v14  }
  0x6b   : > { %1504 = vset.pattern.permute.xlu1 %v1596_v22 }
  0x6c   : > { %625 = vperm.xlu1 %1504, %v1717_v7   ;;  %1521 = vset.pattern.permute.xlu0 %v1596_v22  ;;  %v847_v7 = vld [vmem:[%s2295_s4 + $0x58] sm:$0xff] }
  0x6d   : > { %621 = vperm.xlu0 %1521, %v1703_v4   ;;  %v846_v4 = vld [vmem:[%s2295_s4 + $0x50] sm:$0xff] }
  0x70   : > { %629 = vperm.xlu1 %1504, %v1712_v6  }
  0x71   : > { %633 = vperm.xlu0 %1521, %v1729_v9  }
  0x74   : > { %1505 = vset.pattern.permute.xlu1 %v1593_v3 }
  0x75   : > { %725 = vperm.xlu1 %1505, %v295_v25   ;;  %645 = vperm.xlu0 %1521, %v1736_v10  }
  0x79   : > { %1506 = vset.pattern.permute.xlu1 %v1595_v21  ;;  %657 = vperm.xlu0 %1521, %v1765_v15  }
  0x7a   : > { %533 = vperm.xlu1 %1506, %v1729_v9  }
  0x7d   : > { %665 = vperm.xlu0 %1521, %v1777_v17  }
  0x7e   : > { %1507 = vset.pattern.permute.xlu1 %v1594_v19 }
  0x7f   : > { %441 = vperm.xlu1 %1507, %v1741_v11  }
  0x81   : > { %1526 = vset.pattern.permute.xlu0 %v1593_v3 }
  0x82   : > { %750 = vperm.xlu0 %1526, %v300_v26   ;;  %v474_v26 = vsub.s32 1, %v1871_v36 }
  0x83   : > { %445 = vperm.xlu1 %1507, %v1736_v10  }
  0x86   : > { %765 = vperm.xlu0 %1526, %v303_v27  }
  0x87   : > { %1508 = vset.pattern.permute.xlu1 %v1596_v22 }
  0x88   : > { %637 = vperm.xlu1 %1508, %v1724_v8  }
  0x8a   : > { %775 = vperm.xlu0 %1526, %v305_v28  }
  0x8c   : > { %1509 = vset.pattern.permute.xlu1 %v1593_v3 }
  0x8d   : > { %730 = vperm.xlu1 %1509, %v296_v29   ;;  %v1988_v29 = vrot.slane %v1885_v41, %v474_v26 }
  0x8e   : > { %854 = vperm.xlu0 %1526, %v836_v30  }
  0x91   : > { %v1862_v33 = vpop.permute.xlu1 %320  ;;  %1511 = vset.pattern.permute.xlu1 %v1595_v21  ;;  %v1865_v34 = vpop.permute.xlu0 %310 }
  0x92   : > { %541 = vperm.xlu1 %1511, %v1741_v11   ;;  %864 = vperm.xlu0 %1526, %v838_v31  }
  0x95   : > { %v1873_v37 = vpop.permute.xlu1 %325  ;;  %v1875_v38 = vpop.permute.xlu0 %315 }
  0x96   : > { %545 = vperm.xlu1 %1511, %v1736_v10   ;;  %874 = vperm.xlu0 %1526, %v840_v35   ;;  %v848_v10 = vld [vmem:[%s2295_s4 + $0x60] sm:$0xff]  ;;  %v1107_v35 = vld [vmem:[%s2296_s5 + $0x70] sm:$0xff] }
  0x99   : > { %v1887_v42 = vpop.permute.xlu1 %335  ;;  %v1889_v43 = vpop.permute.xlu0 %330 }
  0x9a   : > { %1512 = vset.pattern.permute.xlu1 %v1594_v19  ;;  %1117 = vperm.xlu0 %1526, %v1094_v39  }
  0x9b   : > { %453 = vperm.xlu1 %1512, %v1748_v12  }
  0x9d   : > { %v1901_v46 = vpop.permute.xlu1 %345  ;;  %v341_v47 = vpop.permute.xlu0 %340 }
  0x9e   : > { %v1904_v48 = vmul.f32 %v1899_v45, %v341_v47  ;;  %879 = vperm.xlu0 %1526, %v841_v44   ;;  %v399_v31 = vmul.f32 %v1899_v45, %v1901_v46  ;;  %v574_v47 = vsub.s32 2, %v1871_v36  ;;  %v1109_v46 = vld [vmem:[#allocation2] sm:$0x1] }
  0x9f   : > { %1513 = vset.pattern.permute.xlu1 %v1596_v22 }
  0xa0   : > { %641 = vperm.xlu1 %1513, %v1741_v11  }
  0xa1   : > { %v1911_v50 = vpop.permute.xlu1 %355  ;;  %v351_v51 = vpop.permute.xlu0 %350 }
  0xa2   : > { %v1914_v52 = vmul.f32 %v1899_v45, %v351_v51  ;;  %884 = vperm.xlu0 %1526, %v842_v49   ;;  %v674_v51 = vsub.s32 3, %v1871_v36 }
  0xa4   : > { %1514 = vset.pattern.permute.xlu1 %v1593_v3 }
  0xa5   : > { %v1923_v55 = vpop.permute.xlu1 %365  ;;  %740 = vperm.xlu1 %1514, %v298_v53   ;;  %v361_v56 = vpop.permute.xlu0 %360 }
  0xa6   : > { %v1926_v57 = vmul.f32 %v1899_v45, %v361_v56  ;;  %889 = vperm.xlu0 %1526, %v843_v54   ;;  %v2009_v54 = vrot.slane %v1885_v41, %v574_v47 }
  0xa9   : > { %v1934_v60 = vpop.permute.xlu1 %375  ;;  %745 = vperm.xlu1 %1514, %v299_v58   ;;  %v371_v61 = vpop.permute.xlu0 %370 }
  0xaa   : > { %v1937_v62 = vmul.f32 %v1899_v45, %v371_v61  ;;  %894 = vperm.xlu0 %1526, %v844_v59   ;;  %v405_v59 = vmul.f32 %v1899_v45, %v1934_v60 }
  0xad   : > { %v1942_v0 = vpop.permute.xlu1 %385  ;;  %1515 = vset.pattern.permute.xlu1 %v1595_v21  ;;  %v381_v1 = vpop.permute.xlu0 %380 }
  0xae   : > { %553 = vperm.xlu1 %1515, %v1748_v12   ;;  %v1947_v2 = vmul.f32 %v1899_v45, %v381_v1  ;;  %899 = vperm.xlu0 %1526, %v845_v63  }
  0xb1   : > { %v1952_v5 = vpop.permute.xlu0 %720 }
  0xb2   : > { %v414_v6 = vpop.permute.xlu1 %413  ;;  %1516 = vset.pattern.permute.xlu1 %v1594_v19  ;;  %904 = vperm.xlu0 %1526, %v846_v4   ;;  %v2024_v4 = vrot.slane %v1885_v41, %v674_v51  ;;  %v302_v41 = vld [vmem:[%s2293_s2 + $0x50] sm:$0xff] }
  0xb3   : > { %457 = vperm.xlu1 %1516, %v1765_v15   ;;  %v477_v1 = vmul.f32 %v1988_v29, %v414_v6 }
  0xb5   : > { %v1959_v8 = vpop.permute.xlu0 %735 }
  0xb6   : > { %v1961_v9 = vpop.permute.xlu1 %417  ;;  %909 = vperm.xlu0 %1526, %v847_v7  }
  0xb7   : > { %1518 = vset.pattern.permute.xlu1 %v1596_v22 }
  0xb8   : > { %649 = vperm.xlu1 %1518, %v1753_v13   ;;  %v850_v13 = vld [vmem:[%s2295_s4 + $0x70] sm:$0xff] }
  0xba   : > { %v410_v11 = vpop.permute.xlu0 %409  ;;  %914 = vperm.xlu0 %1526, %v848_v10  }
  0xbb   : > { %v510_v18 = vpop.permute.xlu1 %509  ;;  %v476_v61 = vmul.f32 %v1988_v29, %v410_v11 }
  0xbc   : > { %653 = vperm.xlu1 %1518, %v1748_v12   ;;  %v851_v12 = vld [vmem:[%s2295_s4 + $0x78] sm:$0xff] }
  0xbe   : > { %v1972_v23 = vpop.permute.xlu0 %421  ;;  %919 = vperm.xlu0 %1526, %v849_v20  }
  0xc0   : > { %1519 = vset.pattern.permute.xlu1 %v1593_v3  ;;  %v610_v25 = vpop.permute.xlu1 %609 }
  0xc1   : > { %755 = vperm.xlu1 %1519, %v301_v24  }
  0xc2   : > { %v1982_v27 = vpop.permute.xlu0 %425  ;;  %924 = vperm.xlu0 %1526, %v850_v13  }
  0xc4   : > { %v614_v28 = vpop.permute.xlu1 %613 }
  0xc5   : > { %1520 = vset.pattern.permute.xlu1 %v1595_v21 }
  0xc6   : > { %557 = vperm.xlu1 %1520, %v1765_v15   ;;  %v438_v30 = vpop.permute.xlu0 %437  ;;  %929 = vperm.xlu0 %1526, %v851_v12   ;;  %v677_v12 = vmul.f32 %v2024_v4, %v614_v28 }
  0xc7   : > { %v483_v32 = vmul.f32 %v1988_v29, %v438_v30 }
  0xc9   : > { %v1998_v39 = vadd.f32 %v483_v32, %v399_v31  ;;  %v2000_v44 = vpop.permute.xlu1 %521 }
  0xca   : > { %1522 = vset.pattern.permute.xlu1 %v1594_v19  ;;  %v450_v15 = vpop.permute.xlu0 %449  ;;  %1182 = vperm.xlu0 %1526, %v1107_v35   ;;  %v392_v19 = vmul.f32 %v1899_v45, %v1865_v34  ;;  %v576_v34 = vmul.f32 %v2009_v54, %v510_v18 }
  0xcb   : > { %v486_v49 = vmul.f32 %v1988_v29, %v450_v15  ;;  %465 = vperm.xlu1 %1522, %v1777_v17  }
  0xcc   : > { %v492_v10 = vadd.f32 %v476_v61, %v392_v19 }
  0xcd   : > { %v502_v53 = vadd.f32 %v486_v49, %v1926_v57  ;;  %v393_v57 = vmul.f32 %v1899_v45, %v1875_v38  ;;  %v676_v38 = vmul.f32 %v2024_v4, %v610_v25 }
  0xce   : > { %v2011_v56 = vpop.permute.xlu1 %429  ;;  %v462_v58 = vpop.permute.xlu0 %461  ;;  %1229 = vperm.xlu0 %1526, %v1109_v46   ;;  %v592_v6 = vadd.f32 %v576_v34, %v492_v10 }
  0xcf   : > { %v489_v63 = vmul.f32 %v1988_v29, %v462_v58  ;;  %469 = vperm.xlu1 %1522, %v1772_v16   ;;  %v493_v24 = vadd.f32 %v477_v1, %v393_v57 }
  0xd0   : > { %v692_v30 = vadd.f32 %v676_v38, %v592_v6 }
  0xd1   : > { %v505_v7 = vadd.f32 %v489_v63, %v405_v59  ;;  %v394_v59 = vmul.f32 %v1899_v45, %v1862_v33 }
  0xd3   : > { %1523 = vset.pattern.permute.xlu1 %v1596_v22  ;;  %v618_v60 = vpop.permute.xlu1 %617  ;;  %v514_v11 = vpop.permute.xlu0 %513 }
  0xd4   : > { %v577_v20 = vmul.f32 %v2009_v54, %v514_v11  ;;  %661 = vperm.xlu1 %1523, %v1760_v14   ;;  %v579_v11 = vmul.f32 %v2009_v54, %v2000_v44 }
  0xd6   : > { %v593_v13 = vadd.f32 %v577_v20, %v493_v24  ;;  %v678_v20 = vmul.f32 %v2024_v4, %v618_v60 }
  0xd7   : > { %v518_v26 = vpop.permute.xlu0 %517 }
  0xd8   : > { %1524 = vset.pattern.permute.xlu1 %v1593_v3  ;;  %v711_v18 = vpop.permute.xlu1 %710  ;;  %v693_v14 = vadd.f32 %v677_v12, %v593_v13  ;;  %v578_v61 = vmul.f32 %v2009_v54, %v518_v26  ;;  %v837_v26 = vld [vmem:[%s2295_s4 + $0x8] sm:$0xff] }
  0xd9   : > { %760 = vperm.xlu1 %1524, %v302_v41   ;;  %v788_v31 = vadd.f32 %v711_v18, %v692_v30 }
  0xdb   : > { %v2036_v32 = vpop.permute.xlu0 %525  ;;  %v804_v47 = vmax.f32 %v788_v31, 0.0 }
  0xdc   : > { %v716_v35 = vpop.permute.xlu1 %715 }
  0xdd   : > { %v789_v25 = vadd.f32 %v716_v35, %v693_v14  ;;  %1525 = vset.pattern.permute.xlu1 %v1595_v21  ;;  %v478_v21 = vmul.f32 %v1988_v29, %v1961_v9  ;;  %v304_v9 = vld [vmem:[%s2293_s2 + $0x60] sm:$0xff]  ;;  %v839_v14 = vld [vmem:[%s2295_s4 + $0x18] sm:$0xff] }
  0xde   : > { %565 = vperm.xlu1 %1525, %v1777_v17   ;;  %v828_v35 = vld [vmem:[%s2294_s3 + $0x40] sm:$0xff] }
  0xdf   : > { %v805_v15 = vmax.f32 %v789_v25, 0.0  ;;  %v2040_v49 = vpop.permute.xlu0 %537  ;;  %v494_v1 = vadd.f32 %v478_v21, %v394_v59  ;;  %v1093_v25 = vld [vmem:[%s2296_s5] sm:$0xff]  ;;  %1390 = vmatprep.mubr.f32.mxu1 %v828_v35  ;;  %v1095_v59 = vld [vmem:[%s2296_s5 + $0x10] sm:$0xff] }
  0xe1   : > { %v1402_v46 = vpack.c.bf16 %v805_v15, %v804_v47  ;;  %v2042_v51 = vpop.permute.xlu1 %529  ;;  %v594_v10 = vadd.f32 %v578_v61, %v494_v1  ;;  %v396_v15 = vmul.f32 %v1899_v45, %v1889_v43 }
  0xe2   : > { %569 = vperm.xlu1 %1525, %v1772_v16   ;;  %v581_v21 = vmul.f32 %v2009_v54, %v2042_v51 }
  0xe3   : > { %v550_v28 = vpop.permute.xlu0 %549  ;;  %1403 = vmatprep.subr.bf16.mxu0 %v1402_v46  ;;  %1434 = vmatprep.subr.bf16.mxu1 %v1402_v46 }
  0xe4   : > { %v586_v58 = vmul.f32 %v2009_v54, %v550_v28  ;;  %1405 = vmatpush3.bf16.msra.mxu0 %v1402_v46  ;;  %1442 = vmatpush3.bf16.msra.mxu1 %v1402_v46  ;;  %v480_v46 = vmul.f32 %v1988_v29, %v1982_v27  ;;  %v481_v28 = vmul.f32 %v1988_v29, %v2011_v56 }
  0xe5   : > { %v580_v27 = vmul.f32 %v2009_v54, %v2036_v32 }
  0xe6   : > { %v2048_v17 = vadd.f32 %v586_v58, %v502_v53  ;;  %1527 = vset.pattern.permute.xlu1 %v1596_v22  ;;  %v2051_v19 = vpop.permute.xlu1 %433  ;;  %v479_v22 = vmul.f32 %v1988_v29, %v1972_v23  ;;  %v694_v23 = vadd.f32 %v678_v20, %v594_v10  ;;  %v397_v58 = vmul.f32 %v1899_v45, %v1887_v42  ;;  %v1096_v42 = vld [vmem:[%s2296_s5 + $0x18] sm:$0xff]  ;;  %v1097_v10 = vld [vmem:[%s2296_s5 + $0x20] sm:$0xff]  ;;  %v1098_v20 = vld [vmem:[%s2296_s5 + $0x28] sm:$0xff] }
  0xe7   : > { %669 = vperm.xlu1 %1527, %v1772_v16   ;;  %v562_v63 = vpop.permute.xlu0 %561  ;;  %v395_v16 = vmul.f32 %v1899_v45, %v1873_v37  ;;  %v307_v37 = vld [vmem:[%s2293_s2 + $0x78] sm:$0xff]  ;;  %v496_v43 = vadd.f32 %v480_v46, %v396_v15 }
  0xe8   : > { %v589_v57 = vmul.f32 %v2009_v54, %v562_v63  ;;  %v790_v44 = vadd.f32 %v1952_v5, %v694_v23  ;;  %v820_v5 = vld [vmem:[%s2294_s3] sm:$0xff]  ;;  %v497_v63 = vadd.f32 %v481_v28, %v397_v58 }
  0xe9   : > { %v495_v24 = vadd.f32 %v479_v22, %v395_v16  ;;  %1378 = vmatprep.mubr.f32.mxu0 %v820_v5  ;;  %v596_v51 = vadd.f32 %v580_v27, %v496_v43  ;;  %v1105_v58 = vld [vmem:[%s2296_s5 + $0x60] sm:$0xff]  ;;  %v1106_v27 = vld [vmem:[%s2296_s5 + $0x68] sm:$0xff] }
  0xea   : > { %v2061_v53 = vadd.f32 %v589_v57, %v505_v7  ;;  %v306_v7 = vld [vmem:[%s2293_s2 + $0x70] sm:$0xff]  ;;  %v806_v18 = vmax.f32 %v790_v44, 0.0  ;;  %v597_v57 = vadd.f32 %v581_v21, %v497_v63 }
  0xeb   : > { %1528 = vset.pattern.permute.xlu1 %v1593_v3  ;;  %v626_v33 = vpop.permute.xlu1 %625  ;;  %v595_v41 = vadd.f32 %v579_v11, %v495_v24 }
  0xec   : > { %770 = vperm.xlu1 %1528, %v304_v9   ;;  %v622_v34 = vpop.permute.xlu0 %621  ;;  %v680_v1 = vmul.f32 %v2024_v4, %v626_v33 }
  0xed   : > { %v679_v38 = vmul.f32 %v2024_v4, %v622_v34 }
  0xee   : > { %v696_v34 = vadd.f32 %v680_v1, %v596_v51 }
  0xef   : > { %v630_v3 = vpop.permute.xlu1 %629  ;;  %v695_v6 = vadd.f32 %v679_v38, %v595_v41  ;;  %v1099_v38 = vld [vmem:[%s2296_s5 + $0x30] sm:$0xff]  ;;  %v1101_v41 = vld [vmem:[%s2296_s5 + $0x40] sm:$0xff] }
  0xf0   : > { %780 = vperm.xlu1 %1528, %v306_v7   ;;  %v681_v56 = vmul.f32 %v2024_v4, %v630_v3  ;;  %v1100_v3 = vld [vmem:[%s2296_s5 + $0x38] sm:$0xff] }
  0xf2   : > { %v697_v9 = vadd.f32 %v681_v56, %v597_v57  ;;  %v1108_v56 = vld [vmem:[%s2296_s5 + $0x78] sm:$0xff] }
  0xf4   : > { %785 = vperm.xlu1 %1528, %v307_v37   ;;  %v726_v60 = vpop.permute.xlu1 %725  ;;  %v793_v32 = vadd.f32 %v1959_v8, %v697_v9 }
  0xf5   : > { %v791_v13 = vadd.f32 %v726_v60, %v695_v6  ;;  %v482_v6 = vmul.f32 %v1988_v29, %v2051_v19  ;;  %v1102_v60 = vld [vmem:[%s2296_s5 + $0x48] sm:$0xff]  ;;  %v1103_v19 = vld [vmem:[%s2296_s5 + $0x50] sm:$0xff] }
  0xf6   : > { %v809_v24 = vmax.f32 %v793_v32, 0.0 }
  0xf7   : > { %v807_v12 = vmax.f32 %v791_v13, 0.0  ;;  %v634_v13 = vpop.permute.xlu0 %633 }
  0xf8   : > { %859 = vperm.xlu1 %1528, %v837_v26   ;;  %v498_v26 = vadd.f32 %v482_v6, %v1904_v48  ;;  %v1104_v48 = vld [vmem:[%s2296_s5 + $0x58] sm:$0xff] }
  0xf9   : > { %v1406_v30 = vpack.c.bf16 %v807_v12, %v806_v18  ;;  %v534_v31 = vpop.permute.xlu1 %533  ;;  %v583_v12 = vmul.f32 %v2009_v54, %v2040_v49 }
  0xfa   : > { %v582_v44 = vmul.f32 %v2009_v54, %v534_v31 }
  0xfb   : > { %1407 = vmatprep.subr.bf16.mxu0 %v1406_v30  ;;  %1435 = vmatprep.subr.bf16.mxu1 %v1406_v30  ;;  %v599_v35 = vadd.f32 %v583_v12, %v1998_v39  ;;  %v646_v43 = vpop.permute.xlu0 %645 }
  0xfc   : > { %869 = vperm.xlu1 %1528, %v839_v14   ;;  %1409 = vmatpush3.bf16.msra.mxu0 %v1406_v30  ;;  %v682_v14 = vmul.f32 %v2024_v4, %v634_v13 }
  0xfd   : > { %1443 = vmatpush3.bf16.msra.mxu1 %v1406_v30  ;;  %v598_v30 = vadd.f32 %v582_v44, %v498_v26  ;;  %v403_v26 = vmul.f32 %v1899_v45, %v1923_v55 }
  0xfe   : > { %v2094_v47 = vpop.permute.xlu1 %441 }
  0xff   : > { %v658_v57 = vpop.permute.xlu0 %657  ;;  %v484_v51 = vmul.f32 %v1988_v29, %v2094_v47 }
 0x100   : > { %1112 = vperm.xlu1 %1528, %v1093_v25   ;;  %v698_v25 = vadd.f32 %v682_v14, %v598_v30 }
 0x102   : > { %v2109_v61 = vpop.permute.xlu1 %445 }
 0x103   : > { %v485_v1 = vmul.f32 %v1988_v29, %v2109_v61 }
 0x104   : > { %1122 = vperm.xlu1 %1528, %v1095_v59  }
 0x107   : > { %v638_v22 = vpop.permute.xlu1 %637 }
 0x108   : > { %1127 = vperm.xlu1 %1528, %v1096_v42   ;;  %v683_v31 = vmul.f32 %v2024_v4, %v638_v22  ;;  %v401_v22 = vmul.f32 %v1899_v45, %v1911_v50 }
 0x10a   : > { %v699_v49 = vadd.f32 %v683_v31, %v599_v35 }
 0x10c   : > { %1132 = vperm.xlu1 %1528, %v1097_v10   ;;  %v731_v16 = vpop.permute.xlu1 %730  ;;  %v500_v10 = vadd.f32 %v484_v51, %v1914_v52 }
 0x10d   : > { %v792_v11 = vadd.f32 %v731_v16, %v696_v34 }
 0x10f   : > { %v808_v7 = vmax.f32 %v792_v11, 0.0  ;;  %v2173_v11 = vpop.permute.xlu0 %665 }
 0x110   : > { %1137 = vperm.xlu1 %1528, %v1098_v20   ;;  %v501_v20 = vadd.f32 %v485_v1, %v401_v22 }
 0x111   : > { %v1410_v33 = vpack.c.bf16 %v809_v24, %v808_v7  ;;  %v542_v23 = vpop.permute.xlu1 %541  ;;  %v685_v7 = vmul.f32 %v2024_v4, %v646_v43 }
 0x112   : > { %v584_v9 = vmul.f32 %v2009_v54, %v542_v23 }
 0x113   : > { %1411 = vmatprep.subr.bf16.mxu0 %v1410_v33  ;;  %1436 = vmatprep.subr.bf16.mxu1 %v1410_v33  ;;  %v751_v23 = vpop.permute.xlu0 %750 }
 0x114   : > { %1142 = vperm.xlu1 %1528, %v1099_v38   ;;  %1413 = vmatpush3.bf16.msra.mxu0 %v1410_v33  ;;  %v600_v47 = vadd.f32 %v584_v9, %v500_v10 }
 0x115   : > { %1444 = vmatpush3.bf16.msra.mxu1 %v1410_v33  ;;  %v546_v8 = vpop.permute.xlu1 %545 }
 0x116   : > { %v585_v32 = vmul.f32 %v2009_v54, %v546_v8 }
 0x118   : > { %1147 = vperm.xlu1 %1528, %v1100_v3   ;;  %v601_v24 = vadd.f32 %v585_v32, %v501_v20 }
 0x11a   : > { %v2134_v37 = vpop.permute.xlu1 %453  ;;  %v701_v3 = vadd.f32 %v685_v7, %v601_v24 }
 0x11b   : > { %v487_v13 = vmul.f32 %v1988_v29, %v2134_v37 }
 0x11c   : > { %1152 = vperm.xlu1 %1528, %v1101_v41  }
 0x11d   : > { %v503_v30 = vadd.f32 %v487_v13, %v403_v26  ;;  %v824_v13 = vld [vmem:[%s2294_s3 + $0x20] sm:$0xff] }
 0x11e   : > { %v832_v26 = vld [vmem:[%s2294_s3 + $0x60] sm:$0xff] }
 0x11f   : > { %v642_v18 = vpop.permute.xlu1 %641 }
 0x120   : > { %1157 = vperm.xlu1 %1528, %v1102_v60   ;;  %v684_v34 = vmul.f32 %v2024_v4, %v642_v18 }
 0x122   : > { %v700_v61 = vadd.f32 %v684_v34, %v600_v47 }
 0x124   : > { %1162 = vperm.xlu1 %1528, %v1103_v19   ;;  %v741_v5 = vpop.permute.xlu1 %740  ;;  %v796_v38 = vadd.f32 %v751_v23, %v700_v61 }
 0x125   : > { %v794_v15 = vadd.f32 %v741_v5, %v698_v25  ;;  %v766_v25 = vpop.permute.xlu0 %765 }
 0x126   : > { %v812_v52 = vmax.f32 %v796_v38, 0.0 }
 0x127   : > { %v810_v21 = vmax.f32 %v794_v15, 0.0 }
 0x128   : > { %1167 = vperm.xlu1 %1528, %v1104_v48   ;;  %v746_v46 = vpop.permute.xlu1 %745 }
 0x129   : > { %v795_v28 = vadd.f32 %v746_v46, %v699_v49 }
 0x12b   : > { %v811_v59 = vmax.f32 %v795_v28, 0.0 }
 0x12c   : > { %1172 = vperm.xlu1 %1528, %v1105_v58  }
 0x12d   : > { %v1414_v63 = vpack.c.bf16 %v811_v59, %v810_v21  ;;  %v554_v39 = vpop.permute.xlu1 %553 }
 0x12e   : > { %v587_v18 = vmul.f32 %v2009_v54, %v554_v39 }
 0x12f   : > { %1415 = vmatprep.subr.bf16.mxu0 %v1414_v63  ;;  %1437 = vmatprep.subr.bf16.mxu1 %v1414_v63 }
 0x130   : > { %1177 = vperm.xlu1 %1528, %v1106_v27   ;;  %1417 = vmatpush3.bf16.msra.mxu0 %v1414_v63  ;;  %v603_v19 = vadd.f32 %v587_v18, %v503_v30  ;;  %v825_v18 = vld [vmem:[%s2294_s3 + $0x28] sm:$0xff]  ;;  %v826_v30 = vld [vmem:[%s2294_s3 + $0x30] sm:$0xff] }
 0x131   : > { %1445 = vmatpush3.bf16.msra.mxu1 %v1414_v63 }
 0x132   : > { %v458_v42 = vpop.permute.xlu1 %457 }
 0x133   : > { %v488_v21 = vmul.f32 %v1988_v29, %v458_v42  ;;  %v776_v42 = vpop.permute.xlu0 %775 }
 0x134   : > { %1187 = vperm.xlu1 %1528, %v1108_v56  }
 0x135   : > { %v504_v39 = vadd.f32 %v488_v21, %v1937_v62  ;;  %v407_v62 = vmul.f32 %v1899_v45, %v1942_v0 }
 0x137   : > { %v650_v16 = vpop.permute.xlu1 %649 }
 0x138   : > { %v686_v31 = vmul.f32 %v2024_v4, %v650_v16 }
 0x13a   : > { %v702_v15 = vadd.f32 %v686_v31, %v2048_v17  ;;  %v688_v17 = vmul.f32 %v2024_v4, %v658_v57  ;;  %v835_v31 = vld [vmem:[%s2294_s3 + $0x78] sm:$0xff] }
 0x13b   : > { %v654_v33 = vpop.permute.xlu1 %653 }
 0x13c   : > { %v687_v14 = vmul.f32 %v2024_v4, %v654_v33 }
 0x13e   : > { %v703_v5 = vadd.f32 %v687_v14, %v603_v19  ;;  %v834_v14 = vld [vmem:[%s2294_s3 + $0x70] sm:$0xff]  ;;  %v827_v19 = vld [vmem:[%s2294_s3 + $0x38] sm:$0xff] }
 0x140   : > { %v756_v50 = vpop.permute.xlu1 %755  ;;  %v799_v48 = vadd.f32 %v766_v25, %v703_v5  ;;  %v855_v5 = vpop.permute.xlu0 %854 }
 0x141   : > { %v797_v41 = vadd.f32 %v756_v50, %v701_v3 }
 0x142   : > { %v815_v28 = vmax.f32 %v799_v48, 0.0 }
 0x143   : > { %v813_v6 = vmax.f32 %v797_v41, 0.0 }
 0x144   : > { %v865_v25 = vpop.permute.xlu0 %864 }
 0x145   : > { %v1418_v8 = vpack.c.bf16 %v813_v6, %v812_v52  ;;  %v558_v44 = vpop.permute.xlu1 %557  ;;  %v829_v52 = vld [vmem:[%s2294_s3 + $0x48] sm:$0xff]  ;;  %v822_v6 = vld [vmem:[%s2294_s3 + $0x10] sm:$0xff] }
 0x146   : > { %v588_v43 = vmul.f32 %v2009_v54, %v558_v44  ;;  %v823_v44 = vld [vmem:[%s2294_s3 + $0x18] sm:$0xff] }
 0x147   : > { %1419 = vmatprep.subr.bf16.mxu0 %v1418_v8  ;;  %1438 = vmatprep.subr.bf16.mxu1 %v1418_v8 }
 0x148   : > { %1421 = vmatpush3.bf16.msra.mxu0 %v1418_v8  ;;  %1446 = vmatpush3.bf16.msra.mxu1 %v1418_v8  ;;  %v604_v27 = vadd.f32 %v588_v43, %v504_v39  ;;  %v830_v8 = vld [vmem:[%s2294_s3 + $0x50] sm:$0xff] }
 0x14a   : > { %v466_v60 = vpop.permute.xlu1 %465  ;;  %v704_v34 = vadd.f32 %v688_v17, %v604_v27 }
 0x14b   : > { %v490_v56 = vmul.f32 %v1988_v29, %v466_v60  ;;  %v831_v60 = vld [vmem:[%s2294_s3 + $0x58] sm:$0xff] }
 0x14d   : > { %v506_v22 = vadd.f32 %v490_v56, %v1947_v2 }
 0x14e   : > { %v470_v12 = vpop.permute.xlu1 %469 }
 0x14f   : > { %v491_v10 = vmul.f32 %v1988_v29, %v470_v12  ;;  %v833_v12 = vld [vmem:[%s2294_s3 + $0x68] sm:$0xff] }
 0x151   : > { %v507_v7 = vadd.f32 %v491_v10, %v407_v62 }
 0x153   : > { %v662_v35 = vpop.permute.xlu1 %661 }
 0x154   : > { %v689_v63 = vmul.f32 %v2024_v4, %v662_v35 }
 0x156   : > { %v705_v51 = vadd.f32 %v689_v63, %v2061_v53  ;;  %v690_v53 = vmul.f32 %v2024_v4, %v2173_v11 }
 0x158   : > { %v761_v49 = vpop.permute.xlu1 %760  ;;  %v801_v32 = vadd.f32 %v776_v42, %v705_v51 }
 0x159   : > { %v798_v37 = vadd.f32 %v761_v49, %v702_v15  ;;  %v875_v15 = vpop.permute.xlu0 %874 }
 0x15a   : > { %v817_v2 = vmax.f32 %v801_v32, 0.0 }
 0x15b   : > { %v814_v46 = vmax.f32 %v798_v37, 0.0 }
 0x15d   : > { %v1422_v55 = vpack.c.bf16 %v815_v28, %v814_v46  ;;  %v566_v58 = vpop.permute.xlu1 %565  ;;  %v1118_v37 = vpop.permute.xlu0 %1117 }
 0x15e   : > { %v590_v9 = vmul.f32 %v2009_v54, %v566_v58 }
 0x15f   : > { %1423 = vmatprep.subr.bf16.mxu0 %v1422_v55  ;;  %1439 = vmatprep.subr.bf16.mxu1 %v1422_v55 }
 0x160   : > { %1425 = vmatpush3.bf16.msra.mxu0 %v1422_v55  ;;  %1447 = vmatpush3.bf16.msra.mxu1 %v1422_v55  ;;  %v606_v57 = vadd.f32 %v590_v9, %v506_v22 }
 0x161   : > { %v570_v59 = vpop.permute.xlu1 %569  ;;  %v880_v28 = vpop.permute.xlu0 %879 }
 0x162   : > { %v591_v20 = vmul.f32 %v2009_v54, %v570_v59  ;;  %v706_v38 = vadd.f32 %v690_v53, %v606_v57 }
 0x164   : > { %v607_v29 = vadd.f32 %v591_v20, %v507_v7 }
 0x165   : > { %v885_v58 = vpop.permute.xlu0 %884 }
 0x166   : > { %v670_v1 = vpop.permute.xlu1 %669 }
 0x167   : > { %v691_v24 = vmul.f32 %v2024_v4, %v670_v1  ;;  %v821_v4 = vld [vmem:[%s2294_s3 + $0x8] sm:$0xff] }
 0x169   : > { %v707_v45 = vadd.f32 %v691_v24, %v607_v29  ;;  %v890_v59 = vpop.permute.xlu0 %889 }
 0x16b   : > { %v771_v16 = vpop.permute.xlu1 %770 }
 0x16c   : > { %v800_v47 = vadd.f32 %v771_v16, %v704_v34 }
 0x16d   : > { %v895_v63 = vpop.permute.xlu0 %894 }
 0x16e   : > { %v816_v61 = vmax.f32 %v800_v47, 0.0 }
 0x16f   : > { %v781_v33 = vpop.permute.xlu1 %780 }
 0x170   : > { %v1426_v23 = vpack.c.bf16 %v817_v2, %v816_v61  ;;  %v802_v3 = vadd.f32 %v781_v33, %v706_v38 }
 0x171   : > { %v900_v17 = vpop.permute.xlu0 %899 }
 0x172   : > { %1427 = vmatprep.subr.bf16.mxu0 %v1426_v23  ;;  %1440 = vmatprep.subr.bf16.mxu1 %v1426_v23  ;;  %v818_v50 = vmax.f32 %v802_v3, 0.0 }
 0x173   : > { %v786_v0 = vpop.permute.xlu1 %785  ;;  %1429 = vmatpush3.bf16.msra.mxu0 %v1426_v23  ;;  %1448 = vmatpush3.bf16.msra.mxu1 %v1426_v23 }
 0x174   : > { %v803_v54 = vadd.f32 %v786_v0, %v707_v45 }
 0x175   : > { %v905_v56 = vpop.permute.xlu0 %904 }
 0x176   : > { %v819_v41 = vmax.f32 %v803_v54, 0.0 }
 0x177   : > { %v860_v35 = vpop.permute.xlu1 %859 }
 0x178   : > { %v1430_v11 = vpack.c.bf16 %v819_v41, %v818_v50 }
 0x179   : > { %v910_v1 = vpop.permute.xlu0 %909 }
 0x17a   : > { %1431 = vmatprep.subr.bf16.mxu0 %v1430_v11  ;;  %1441 = vmatprep.subr.bf16.mxu1 %v1430_v11 }
 0x17b   : > { %1433 = vmatpush3.bf16.msra.mxu0 %v1430_v11  ;;  %1449 = vmatpush3.bf16.msra.mxu1 %v1430_v11  ;;  %v870_v48 = vpop.permute.xlu1 %869 }
 0x17d   : > { %v915_v29 = vpop.permute.xlu0 %914 }
 0x17e   : > { %1379 = vmatmul.mubr.f32.vlgmr.msra.gmra.mrb[0].mxu0 %v821_v4  ;;  %1391 = vmatmul.mubr.f32.vlgmr.msra.gmra.mrb[0].mxu1 %v829_v52 }
 0x17f   : > { %1381 = vmatprep.mubr.f32.mxu0 %v822_v6  ;;  %1393 = vmatprep.mubr.f32.mxu1 %v830_v8  ;;  %v1113_v49 = vpop.permute.xlu1 %1112 }
 0x182   : > { %1382 = vmatmul.mubr.f32.gmra.mrb[2].mxu0 %v823_v44  ;;  %1394 = vmatmul.mubr.f32.gmra.mrb[2].mxu1 %v831_v60 }
 0x183   : > { %1384 = vmatprep.mubr.f32.mxu0 %v824_v13  ;;  %1396 = vmatprep.mubr.f32.mxu1 %v832_v26  ;;  %v1123_v46 = vpop.permute.xlu1 %1122 }
 0x186   : > { %1385 = vmatmul.mubr.f32.gmra.mrb[4].mxu0 %v825_v18  ;;  %1397 = vmatmul.mubr.f32.gmra.mrb[4].mxu1 %v833_v12 }
 0x187   : > { %1387 = vmatprep.mubr.f32.mxu0 %v826_v30  ;;  %1399 = vmatprep.mubr.f32.mxu1 %v834_v14  ;;  %v1128_v55 = vpop.permute.xlu1 %1127 }
 0x18a   : > { %1388 = vmatmul.mubr.f32.gmra.mrb[6].mxu0 %v827_v19  ;;  %1400 = vmatmul.mubr.f32.gmra.mrb[6].mxu1 %v835_v31 }
 0x18b   : > { %v1133_v21 = vpop.permute.xlu1 %1132 }
 0x18f   : > { %v1138_v43 = vpop.permute.xlu1 %1137 }
 0x193   : > { %v1143_v39 = vpop.permute.xlu1 %1142 }
 0x197   : > { %v1148_v27 = vpop.permute.xlu1 %1147 }
 0x19b   : > { %v1153_v51 = vpop.permute.xlu1 %1152 }
 0x19f   : > { %v1158_v16 = vpop.permute.xlu1 %1157 }
 0x1a3   : > { %v1163_v52 = vpop.permute.xlu1 %1162 }
 0x251   : > { %v1380_v9 = vpop.f32.mrb[0].mxu0  ;;  %v1392_v42 = vpop.f32.mrb[0].mxu1 }
 0x252   : > { %v1004_v22 = vadd.f32 %v1380_v9, %v860_v35  ;;  %v998_v10 = vpop.f32.mrb[1].mxu0  ;;  %v1038_v32 = vpop.f32.mrb[1].mxu1 }
 0x253   : > { %v999_v34 = vadd.f32 %v998_v10, %v855_v5  ;;  %v1039_v14 = vadd.f32 %v1038_v32, %v895_v63  ;;  %v920_v35 = vpop.permute.xlu0 %919 }
 0x254   : > { %v1078_v62 = vmax.f32 %v1004_v22, 0.0 }
 0x255   : > { %v1077_v57 = vmax.f32 %v999_v34, 0.0  ;;  %v1383_v20 = vpop.f32.mrb[2].mxu0  ;;  %v1395_v47 = vpop.f32.mrb[2].mxu1 }
 0x256   : > { %v1191_v53 = vmul.f32 %v1118_v37, %v1078_v62  ;;  %v1014_v7 = vadd.f32 %v1383_v20, %v870_v48  ;;  %v1008_v24 = vpop.f32.mrb[3].mxu0  ;;  %v1048_v61 = vpop.f32.mrb[3].mxu1  ;;  %v1054_v34 = vadd.f32 %v1395_v47, %v910_v1 }
 0x257   : > { %v1190_v2 = vmul.f32 %v1113_v49, %v1077_v57  ;;  %v1009_v33 = vadd.f32 %v1008_v24, %v865_v25  ;;  %v1044_v25 = vadd.f32 %v1392_v42, %v900_v17  ;;  %v925_v57 = vpop.permute.xlu0 %924 }
 0x258   : > { %v1080_v38 = vmax.f32 %v1014_v7, 0.0 }
 0x259   : > { %v1206_v23 = vadd.f32 %v1191_v53, %v1190_v2  ;;  %v1079_v3 = vmax.f32 %v1009_v33, 0.0  ;;  %v1386_v45 = vpop.f32.mrb[4].mxu0  ;;  %v1398_v0 = vpop.f32.mrb[4].mxu1  ;;  %v1086_v10 = vmax.f32 %v1044_v25, 0.0 }
 0x25a   : > { %v1024_v54 = vadd.f32 %v1386_v45, %v880_v28  ;;  %v1018_v50 = vpop.f32.mrb[5].mxu0  ;;  %v1058_v41 = vpop.f32.mrb[5].mxu1  ;;  %v1193_v6 = vmul.f32 %v1128_v55, %v1080_v38  ;;  %v1085_v28 = vmax.f32 %v1039_v14, 0.0  ;;  %v1049_v55 = vadd.f32 %v1048_v61, %v905_v56 }
 0x25b   : > { %v1192_v11 = vmul.f32 %v1123_v46, %v1079_v3  ;;  %v1019_v4 = vadd.f32 %v1018_v50, %v875_v15  ;;  %v1168_v46 = vpop.permute.xlu1 %1167  ;;  %v1059_v32 = vadd.f32 %v1058_v41, %v915_v29  ;;  %v1199_v17 = vmul.f32 %v1158_v16, %v1086_v10 }
 0x25c   : > { %v1082_v44 = vmax.f32 %v1024_v54, 0.0  ;;  %v1198_v63 = vmul.f32 %v1153_v51, %v1085_v28  ;;  %v1064_v42 = vadd.f32 %v1398_v0, %v920_v35 }
 0x25d   : > { %v1207_v8 = vadd.f32 %v1206_v23, %v1192_v11  ;;  %v1081_v60 = vmax.f32 %v1019_v4, 0.0  ;;  %v1389_v13 = vpop.f32.mrb[6].mxu0  ;;  %v1401_v26 = vpop.f32.mrb[6].mxu1  ;;  %v1089_v24 = vmax.f32 %v1059_v32, 0.0 }
 0x25e   : > { %v1034_v18 = vadd.f32 %v1389_v13, %v890_v59  ;;  %v1028_v12 = vpop.f32.mrb[7].mxu0  ;;  %v1068_v30 = vpop.f32.mrb[7].mxu1  ;;  %v1195_v48 = vmul.f32 %v1138_v43, %v1082_v44  ;;  %v1088_v43 = vmax.f32 %v1054_v34, 0.0  ;;  %v1090_v33 = vmax.f32 %v1064_v42, 0.0 }
 0x25f   : > { %v1194_v19 = vmul.f32 %v1133_v21, %v1081_v60  ;;  %v1208_v31 = vadd.f32 %v1207_v8, %v1193_v6  ;;  %v1029_v5 = vadd.f32 %v1028_v12, %v885_v58  ;;  %v1087_v21 = vmax.f32 %v1049_v55, 0.0  ;;  %v1173_v20 = vpop.permute.xlu1 %1172 }
 0x260   : > { %v1084_v37 = vmax.f32 %v1034_v18, 0.0  ;;  %v1069_v56 = vadd.f32 %v1068_v30, %v925_v57  ;;  %v1201_v61 = vmul.f32 %v1168_v46, %v1088_v43  ;;  %v1202_v51 = vmul.f32 %v1173_v20, %v1089_v24 }
 0x261   : > { %v1209_v49 = vadd.f32 %v1208_v31, %v1194_v19  ;;  %v1083_v15 = vmax.f32 %v1029_v5, 0.0  ;;  %v1200_v7 = vmul.f32 %v1163_v52, %v1087_v21 }
 0x262   : > { %v1197_v59 = vmul.f32 %v1148_v27, %v1084_v37  ;;  %v1091_v23 = vmax.f32 %v1069_v56, 0.0 }
 0x263   : > { %v1196_v9 = vmul.f32 %v1143_v39, %v1083_v15  ;;  %v1210_v22 = vadd.f32 %v1209_v49, %v1195_v48  ;;  %v930_v39 = vpop.permute.xlu0 %929  ;;  %v1178_v47 = vpop.permute.xlu1 %1177 }
 0x264   : > { %v1074_v1 = vadd.f32 %v1401_v26, %v930_v39  ;;  %v1203_v38 = vmul.f32 %v1178_v47, %v1090_v33 }
 0x265   : > { %v1211_v62 = vadd.f32 %v1210_v22, %v1196_v9 }
 0x266   : > { %v1092_v3 = vmax.f32 %v1074_v1, 0.0 }
 0x267   : > { %v1212_v58 = vadd.f32 %v1211_v62, %v1197_v59  ;;  %v1183_v45 = vpop.permute.xlu0 %1182  ;;  %v1188_v50 = vpop.permute.xlu1 %1187 }
 0x268   : > { %v1204_v0 = vmul.f32 %v1183_v45, %v1091_v23  ;;  %v1205_v41 = vmul.f32 %v1188_v50, %v1092_v3 }
 0x269   : > { %v1213_v53 = vadd.f32 %v1212_v58, %v1198_v63 }
 0x26b   : > { %v1214_v2 = vadd.f32 %v1213_v53, %v1199_v17  ;;  %v1230_v60 = vpop.permute.xlu0 %1229 }
 0x26c   : > { %v1235_v26 = vrot.slane %v1230_v60, %v390_v40 }
 0x26d   : > { %v1215_v27 = vadd.f32 %v1214_v2, %v1200_v7 }
 0x26f   : > { %v1216_v29 = vadd.f32 %v1215_v27, %v1201_v61 }
 0x271   : > { %v1217_v16 = vadd.f32 %v1216_v29, %v1202_v51 }
 0x273   : > { %v1218_v54 = vadd.f32 %v1217_v16, %v1203_v38 }
 0x275   : > { %v1219_v11 = vadd.f32 %v1218_v54, %v1204_v0 }
 0x277   : > { %v1220_v4 = vadd.f32 %v1219_v11, %v1205_v41 }
 0x279   : > { %v1221_v52 = vrot.slane %v1220_v4, 4 }
 0x27b   : > { %v1222_v6 = vadd.f32 %v1221_v52, %v1220_v4 }
 0x27d   : > { %v1223_v8 = vrot.slane %v1222_v6, 2 }
 0x27f   : > { %v1224_v44 = vadd.f32 %v1223_v8, %v1222_v6 }
 0x281   : > { %v1225_v13 = vrot.slane %v1224_v44, 1 }
 0x283   : > { %v1226_v18 = vadd.f32 %v1225_v13, %v1224_v44 }
 0x285   : > { %v1236_v12 = vadd.f32 %v1235_v26, %v1226_v18 }
 0x287   : > { %1237 = vst [vmem:[%s270_s16] sm:$0x1] %v1236_v12 }
 0x288   : > { %1542 = shalt.err (!%p1539_p3)
}
 0x289   : > { %s1543_s25 = scalar_lea.hbm %s2249_s20, 16  ;;  %s1547_s10 = scalar_lea.hbm %s2298_s7, 32 }
 0x28a   : > { %p1544_p4 = scmp.ne.s32.totalorder %s2249_s20, %s1543_s25  ;;  %p1548_p9 = scmp.lt.u32.totalorder %s2249_s20, %s2298_s7 }
 0x28b   : > { %p1549_p10 = scmp.lt.u32.totalorder %s1547_s10, %s1543_s25  ;;  %p1551_p12 = scmp.lt.u32.totalorder %s1543_s25, %s2249_s20 }
 0x28c   : > { %p1545_p7 = pnand %p1544_p4, %p1679_p5 }
 0x28d   : > { %p1550_p11 = por %p1549_p10, %p1548_p9 }
 0x28e   : > { %p1546_p8 = pneg %p1545_p7 }
 0x28f   : > { %p1552_p13 = por %p1551_p12, %p1550_p11 }
 0x291   : > { %p1553_p0 = pnand %p1552_p13, %p1546_p8 }
 0x293   : > { %1556 = shalt.err (!%p1553_p0)
}
 0x294   : > { %1450 = dma.vmem_to_hbm [thread:$0]  (%p1679_p5), %s2251_s17, 16, %s2249_s20, %s1239_s21  }
 0x295 PF: > { %p1456_p1 = scmp.ge.s32.totalorder %s1591_s29, 2  ;;  %s1263_s16 = sand.u32 1, %s1579_s26  }
 0x296   : > { %s1264_s18 = scalar_lea.sflag [#allocation4], %s1263_s16 }
 0x297   : > { %p1453_p2 = pnand %p1456_p1, %p1683_p6 }
 0x299   : > { %1574 = dma.done.wait (!%p1453_p2), %s1264_s18, 16  }
 0x29a   : > { %1576 = vsyncadd (!%p1453_p2), %s1264_s18, 4294967280  ;;  %p19_p3 = scmp.ge.s32.totalorder %s1666_s8, 4   ;;  %s2301_s26 = smov %s1583_s27 }
 0x29b   : > { %s2302_s27 = smov %s1587_s28  ;;  %s2303_s28 = smov %s1677_s11 }
 0x29c   : > { %s2304_s29 = smov %s1666_s8  ;;  %21 = sbr.rel (!%p19_p3) target bundleno = 6 (0x6), region = 83 }
 0x2a3   :  { %1268 = vsyncpa [#allocation4], 1 }
 0x2a4   :  { %1270 = vsyncpa [#allocation4 + $0x1], 1 }

</bundles_post_ra>
